<compile_context>
chip_gen: v7x
topology: tpu7x:2x2x1
jax: 0.10.0
libtpu: 0.0.40
codegen_flags: <defaults>
</compile_context>

<pallas_src>
import functools
import math
import random

import jax
import jax.numpy as jnp
import numpy as np
from jax.experimental import pallas as pl
from jax.experimental.pallas import tpu as pltpu

NEG_INF = -1e30  # python float (a jnp scalar here would be a captured kernel constant)


# ----------------------------- in-kernel math helpers -----------------------------

def _rmsnorm(x, w, eps):
    var = jnp.mean(x * x, axis=-1, keepdims=True)
    return x * jax.lax.rsqrt(var + eps) * w


def _layer_math(h, ln1, wqkv, wo, ln2, wgu, wd, past_k, past_v, *,
                n_heads, head_dim, inter, eps):
    """One decoder layer on an (S, H) residual slab. Returns (h_new, kv_slab).

    kv_slab is the (S, 2H) K|V slice of the fused QKV matmul output (lane-dense
    cache store). past_k/past_v are (P, H) bf16 lane-dense slabs or None.
    """
    S, H = h.shape
    nH, Dh = n_heads, head_dim
    scale = 1.0 / math.sqrt(Dh)

    # ---- pre-attention RMSNorm (f32) + fused Q|K|V matmul (bf16 MXU, f32 acc) ----
    xn = _rmsnorm(h, ln1, eps)
    qkv = jnp.dot(xn.astype(jnp.bfloat16), wqkv,
                  preferred_element_type=jnp.float32)            # (S, 3H)
    kv_slab = qkv[:, H:]                                         # (S, 2H)  K|V slab

    # scale folded into q (S*Dh elements, not S*Skv)
    q3 = (qkv[:, :H] * scale).astype(jnp.bfloat16).reshape(S, nH, Dh)
    k3 = qkv[:, H:2 * H].astype(jnp.bfloat16).reshape(S, nH, Dh)
    v3 = qkv[:, 2 * H:].astype(jnp.bfloat16).reshape(S, nH, Dh)

    # ---- head-batched scores; causal mask only over the NEW columns ----
    s_new = jnp.einsum('qhd,khd->hqk', q3, k3,
                       preferred_element_type=jnp.float32)       # (nH, S, S)
    row = jax.lax.broadcasted_iota(jnp.int32, (S, S), 0)
    col = jax.lax.broadcasted_iota(jnp.int32, (S, S), 1)
    s_new = jnp.where((col <= row)[None, :, :], s_new, NEG_INF)

    if past_k is not None:
        P = past_k.shape[0]
        pk3 = past_k.reshape(P, nH, Dh)
        pv3 = past_v.reshape(P, nH, Dh)
        s_past = jnp.einsum('qhd,khd->hqk', q3, pk3,
                            preferred_element_type=jnp.float32)  # (nH, S, P)
        m = jnp.maximum(jnp.max(s_new, axis=-1, keepdims=True),
                        jnp.max(s_past, axis=-1, keepdims=True))
        p_new = jnp.exp(s_new - m)
        p_past = jnp.exp(s_past - m)
        denom = (jnp.sum(p_new, axis=-1, keepdims=True)
                 + jnp.sum(p_past, axis=-1, keepdims=True))
        inv = pl.reciprocal(denom, approx=True)                  # EUP slot
        o3 = (jnp.einsum('hqk,khd->qhd', (p_new * inv).astype(jnp.bfloat16), v3,
                         preferred_element_type=jnp.float32)
              + jnp.einsum('hqk,khd->qhd', (p_past * inv).astype(jnp.bfloat16), pv3,
                           preferred_element_type=jnp.float32))  # (S, nH, Dh)
    else:
        m = jnp.max(s_new, axis=-1, keepdims=True)
        p = jnp.exp(s_new - m)
        inv = pl.reciprocal(jnp.sum(p, axis=-1, keepdims=True), approx=True)
        o3 = jnp.einsum('hqk,khd->qhd', (p * inv).astype(jnp.bfloat16), v3,
                        preferred_element_type=jnp.float32)

    ao = o3.reshape(S, H)

    # ---- output projection + residual ----
    h1 = h + jnp.dot(ao.astype(jnp.bfloat16), wo, preferred_element_type=jnp.float32)

    # ---- pre-MLP RMSNorm + fused gate|up, SiLU, down projection + residual ----
    x2 = _rmsnorm(h1, ln2, eps)
    gu = jnp.dot(x2.astype(jnp.bfloat16), wgu, preferred_element_type=jnp.float32)
    g = gu[:, :inter]
    u = gu[:, inter:]
    hmid = (g * jax.nn.sigmoid(g)) * u
    h2 = h1 + jnp.dot(hmid.astype(jnp.bfloat16), wd, preferred_element_type=jnp.float32)
    return h2, kv_slab


# ----------------------------- fused whole-decoder kernels -----------------------------

def _prefill_kernel(h_ref, ln1_ref, wqkv_ref, wo_ref, ln2_ref, wgu_ref, wd_ref,
                    kv_ref, h_sc, *, n_heads, head_dim, inter, eps):
    """grid = (B, L): all layers of one batch row; residual h carried in VMEM scratch."""
    l = pl.program_id(1)

    @pl.when(l == 0)
    def _():
        h_sc[...] = h_ref[0]

    h_new, kv_slab = _layer_math(
        h_sc[...], ln1_ref[0], wqkv_ref[0], wo_ref[0], ln2_ref[0],
        wgu_ref[0], wd_ref[0], None, None,
        n_heads=n_heads, head_dim=head_dim, inter=inter, eps=eps)

    kv_ref[0, 0] = kv_slab.astype(kv_ref.dtype)   # lane-dense bf16 (S, 2H) cache store
    h_sc[...] = h_new


def _decode_kernel(h_ref, pk_ref, pv_ref, ln1_ref, wqkv_ref, wo_ref, ln2_ref,
                   wgu_ref, wd_ref, wn_ref, wl_ref, logits_ref, h_sc, *,
                   n_heads, head_dim, inter, eps):
    """grid = (B, L): all layers + final RMSNorm + lm_head fused; logits written at l==L-1."""
    l = pl.program_id(1)
    nl = pl.num_programs(1)

    @pl.when(l == 0)
    def _():
        h_sc[...] = h_ref[0]

    h_new, _ = _layer_math(
        h_sc[...], ln1_ref[0], wqkv_ref[0], wo_ref[0], ln2_ref[0],
        wgu_ref[0], wd_ref[0], pk_ref[0, 0], pv_ref[0, 0],
        n_heads=n_heads, head_dim=head_dim, inter=inter, eps=eps)
    h_sc[...] = h_new

    @pl.when(l == nl - 1)
    def _():
        xn = _rmsnorm(h_new, wn_ref[...], eps)
        logits_ref[0] = jnp.dot(xn.astype(jnp.bfloat16), wl_ref[...],
                                preferred_element_type=jnp.float32
                                ).astype(logits_ref.dtype)


# ----------------------------- Synthetic LLaMA-style decoder -----------------------------

class Decoder:
    """Tiny LLaMA-style decoder. Embedding gather and cache-layout plumbing are plain
    JAX glue; the whole transformer stack runs as ONE fused Pallas kernel per pass."""

    def __init__(self, key, vocab=128, hidden=32, n_heads=2, head_dim=16,
                 inter=64, n_layers=2, eps=1e-6):
        assert n_heads * head_dim == hidden
        self.vocab, self.hidden = vocab, hidden
        self.n_heads, self.head_dim = n_heads, head_dim
        self.inter, self.n_layers, self.eps = inter, n_layers, eps

        keys = jax.random.split(key, 2 + n_layers)
        init = lambda k, shape: 0.02 * jax.random.normal(k, shape, jnp.float32)
        self.embed = init(keys[0], (vocab, hidden))
        self.lm_head = init(keys[1], (hidden, vocab)).astype(jnp.bfloat16)
        self.final_norm = jnp.ones((1, hidden), jnp.float32)

        wqkv, wo, wgu, wd = [], [], [], []
        for l in range(n_layers):
            kq, kk, kv, ko, kg, ku, kd = jax.random.split(keys[2 + l], 7)
            wqkv.append(jnp.concatenate([init(kq, (hidden, hidden)),
                                         init(kk, (hidden, hidden)),
                                         init(kv, (hidden, hidden))], axis=1))
            wo.append(init(ko, (hidden, hidden)))
            wgu.append(jnp.concatenate([init(kg, (hidden, inter)),
                                        init(ku, (hidden, inter))], axis=1))
            wd.append(init(kd, (inter, hidden)))
        # Per-layer weights stacked along a leading L axis (streamed per grid step).
        self.wqkv_all = jnp.stack(wqkv).astype(jnp.bfloat16)   # (L, H, 3H)
        self.wo_all = jnp.stack(wo).astype(jnp.bfloat16)       # (L, H, H)
        self.wgu_all = jnp.stack(wgu).astype(jnp.bfloat16)     # (L, H, 2*inter)
        self.wd_all = jnp.stack(wd).astype(jnp.bfloat16)       # (L, inter, H)
        self.ln1_all = jnp.ones((n_layers, 1, hidden), jnp.float32)
        self.ln2_all = jnp.ones((n_layers, 1, hidden), jnp.float32)

    # --------------- fused whole-stack wrappers ---------------

    def _prefill(self, h):
        B, S, H = h.shape
        L, nH, Dh, I = self.n_layers, self.n_heads, self.head_dim, self.inter
        kernel = functools.partial(_prefill_kernel, n_heads=nH, head_dim=Dh,
                                   inter=I, eps=self.eps)
        kv = pl.pallas_call(
            kernel,
            grid=(B, L),
            out_shape=jax.ShapeDtypeStruct((L, B, S, 2 * H), jnp.bfloat16),
            in_specs=[
                pl.BlockSpec((1, S, H), lambda b, l: (b, 0, 0)),
                pl.BlockSpec((1, 1, H), lambda b, l: (l, 0, 0)),
                pl.BlockSpec((1, H, 3 * H), lambda b, l: (l, 0, 0)),
                pl.BlockSpec((1, H, H), lambda b, l: (l, 0, 0)),
                pl.BlockSpec((1, 1, H), lambda b, l: (l, 0, 0)),
                pl.BlockSpec((1, H, 2 * I), lambda b, l: (l, 0, 0)),
                pl.BlockSpec((1, I, H), lambda b, l: (l, 0, 0)),
            ],
            out_specs=pl.BlockSpec((1, 1, S, 2 * H), lambda b, l: (l, b, 0, 0)),
            scratch_shapes=[pltpu.VMEM((S, H), jnp.float32)],   # residual carried over L
            compiler_params=pltpu.CompilerParams(
                dimension_semantics=("parallel", "arbitrary")),
        )(h, self.ln1_all, self.wqkv_all, self.wo_all, self.ln2_all,
          self.wgu_all, self.wd_all)
        # Host-side layout plumbing: lane-dense (L,B,S,2H) -> reference (2,L,B,nH,S,Dh).
        kv = kv.reshape(L, B, S, 2, nH, Dh)
        return jnp.transpose(kv, (3, 0, 1, 4, 2, 5))

    def _decode(self, h, kv_caches):
        # kv_caches: (2, L, B, nH, P, Dh) bf16
        B, S, H = h.shape
        L, nH, Dh, I, V = self.n_layers, self.n_heads, self.head_dim, self.inter, self.vocab
        P = kv_caches.shape[4]
        # Host-side layout plumbing: past K/V presented lane-dense (L, B, P, H) bf16.
        pk = jnp.transpose(kv_caches[0], (0, 1, 3, 2, 4)).reshape(L, B, P, H).astype(jnp.bfloat16)
        pv = jnp.transpose(kv_caches[1], (0, 1, 3, 2, 4)).reshape(L, B, P, H).astype(jnp.bfloat16)
        kernel = functools.partial(_decode_kernel, n_heads=nH, head_dim=Dh,
                                   inter=I, eps=self.eps)
        # TODO(synk): for v7x with B=1, add a second "parallel" grid axis (e.g. query-row
        # tiles for attention/lm_head) so both TensorCores get work; and when scaling to
        # real LLaMA dims, tile weight N-dims / past-KV seq and set vmem_limit_bytes.
        return pl.pallas_call(
            kernel,
            grid=(B, L),
            out_shape=jax.ShapeDtypeStruct((B, S, V), jnp.float32),
            in_specs=[
                pl.BlockSpec((1, S, H), lambda b, l: (b, 0, 0)),
                pl.BlockSpec((1, 1, P, H), lambda b, l: (l, b, 0, 0)),
                pl.BlockSpec((1, 1, P, H), lambda b, l: (l, b, 0, 0)),
                pl.BlockSpec((1, 1, H), lambda b, l: (l, 0, 0)),
                pl.BlockSpec((1, H, 3 * H), lambda b, l: (l, 0, 0)),
                pl.BlockSpec((1, H, H), lambda b, l: (l, 0, 0)),
                pl.BlockSpec((1, 1, H), lambda b, l: (l, 0, 0)),
                pl.BlockSpec((1, H, 2 * I), lambda b, l: (l, 0, 0)),
                pl.BlockSpec((1, I, H), lambda b, l: (l, 0, 0)),
                pl.BlockSpec((1, H), lambda b, l: (0, 0)),
                pl.BlockSpec((H, V), lambda b, l: (0, 0)),
            ],
            out_specs=pl.BlockSpec((1, S, V), lambda b, l: (b, 0, 0)),
            scratch_shapes=[pltpu.VMEM((S, H), jnp.float32)],
            compiler_params=pltpu.CompilerParams(
                dimension_semantics=("parallel", "arbitrary")),
        )(h, pk, pv, self.ln1_all, self.wqkv_all, self.wo_all, self.ln2_all,
          self.wgu_all, self.wd_all, self.final_norm, self.lm_head)

    # --------------- forward ---------------

    def __call__(self, input_ids=None, prefill=False, kv_caches=None, labels=None):
        return self.forward(input_ids, prefill=prefill, kv_caches=kv_caches, labels=labels)

    def forward(self, input_ids, prefill=False, kv_caches=None, labels=None):
        h = jnp.take(self.embed, input_ids, axis=0)              # (B, S, H) embedding gather
        # TODO(synk): rotary position embeddings of the real LLaMA decoder are omitted.
        if prefill:
            return self._prefill(h)                              # (2, L, B, nH, S, Dh) bf16
        assert kv_caches is not None
        logits = self._decode(h, kv_caches)                      # (B, S, V) f32
        # TODO(synk): the reference Decoder's label/loss convention is not defined here;
        # logits are returned regardless of `labels`.
        return logits


# ----------------------------- Model (reference forward, mirrored) -----------------------------

def segment(x, dim, n):
    assert dim == -1
    size = x.shape[-1]
    return [x[..., i:i + n] for i in range(0, size, n)]


class Model:
    def __init__(self, decoder, chunk_size, trainable_token):
        self.decoder = decoder
        self.chunk_size = chunk_size
        self.num_trainable_chunk = trainable_token // chunk_size

    def forward(self, input_ids, labels=None, local_rank=None, **kwargs):
        label_exist = labels is not None
        if input_ids.ndim == 3:
            input_ids = input_ids.reshape(-1, input_ids.shape[-1])
        if label_exist and labels.ndim == 3:
            labels = labels.reshape(-1, labels.shape[-1])

        input_chunks = segment(input_ids, dim=-1, n=self.chunk_size)
        prefil_chunk = input_chunks[:-1]
        remain_chunk = input_chunks[-1]
        num_prefil_chunk = len(prefil_chunk)
        num_trainable_chunk = min(num_prefil_chunk - 1, self.num_trainable_chunk)

        prefil_chunk = jnp.concatenate(prefil_chunk, axis=0)                  # (P, cs)
        shift_chunk = jnp.concatenate(
            [jnp.zeros((1, self.chunk_size), dtype=input_ids.dtype),
             prefil_chunk[:-1]], axis=0)
        concat_chunk = jnp.concatenate([shift_chunk, prefil_chunk], axis=-1)  # (P, 2*cs)

        if label_exist:
            labels = labels[..., -remain_chunk.shape[-1]:]

        # Deterministic stand-in for `random.sample` (host-side python glue).
        train_idx = random.Random(0).sample(range(0, num_prefil_chunk),
                                            k=num_trainable_chunk)
        select_mask = np.array([x in train_idx for x in range(num_prefil_chunk)])

        # Perf: the reference runs two prefill passes (trainable grad-path + frozen
        # no_grad).  Batch rows are independent in the decoder, so both passes are
        # merged into ONE fused prefill call over all chunks; rows split on the host.
        kv_all = self.decoder(input_ids=concat_chunk, prefill=True)   # (2, L, P, nH, 2cs, Dh)
        assert kv_all.ndim == 6 and kv_all.shape[0] == 2

        # NOTE: the reference builds the decode cache only from the *frozen* pass
        # results (it iterates `kv_cache`, the frozen tuple, not `kv_caches`), i.e. the
        # non-selected chunks in increasing original order; reproduced exactly here.
        frozen_idx = np.nonzero(~select_mask)[0]
        frozen = [kv_all[:, :, int(i):int(i) + 1, :, -self.chunk_size:, :]
                  for i in frozen_idx]
        kv_caches = jnp.concatenate(frozen, axis=-2)   # (2, L, 1, nH, nF*cs, Dh)

        outputs = self.decoder.forward(remain_chunk, kv_caches=kv_caches, labels=labels)
        return outputs


if __name__ == "__main__":
    key = jax.random.PRNGKey(0)
    chunk_size = 8
    trainable_token = 16
    vocab = 128

    decoder = Decoder(key, vocab=vocab, hidden=32, n_heads=2, head_dim=16,
                      inter=64, n_layers=2)
    model = Model(decoder, chunk_size=chunk_size, trainable_token=trainable_token)

    # (1, 40) tokens -> 4 prefill chunks of 8 + 1 remain chunk of 8.
    input_ids = jax.random.randint(jax.random.PRNGKey(0), (1, 40), 0, vocab,
                                   dtype=jnp.int32)
    out = model.forward(input_ids)
    jax.block_until_ready(out)
    assert out.shape == (1, chunk_size, vocab)
    print("KERNEL_OK")
</pallas_src>

<mosaic_0001>
module attributes {stable_mosaic.version = 11 : i64} {
  func.func @_prefill_kernel(%arg0: i32, %arg1: i32, %arg2: memref<1x16x32xf32, #tpu.memory_space<vmem>>, %arg3: memref<1x1x32xf32, #tpu.memory_space<vmem>>, %arg4: memref<1x32x96xbf16, #tpu.memory_space<vmem>>, %arg5: memref<1x32x32xbf16, #tpu.memory_space<vmem>>, %arg6: memref<1x1x32xf32, #tpu.memory_space<vmem>>, %arg7: memref<1x32x128xbf16, #tpu.memory_space<vmem>>, %arg8: memref<1x64x32xbf16, #tpu.memory_space<vmem>>, %arg9: memref<1x1x16x64xbf16, #tpu.memory_space<vmem>>, %arg10: memref<16x32xf32, #tpu.memory_space<vmem>>) attributes {dimension_semantics = [#tpu.dimension_semantics<parallel>, #tpu.dimension_semantics<arbitrary>], iteration_bounds = array<i64: 4, 2>, scalar_prefetch = 0 : i64, scratch_operands = 1 : i64, tpu.core_type = #tpu.core_type<tc>, window_params = [{transform_indices = @transform_0, window_bounds = array<i64: 1, 16, 32>}, {transform_indices = @transform_1, window_bounds = array<i64: 1, 1, 32>}, {transform_indices = @transform_2, window_bounds = array<i64: 1, 32, 96>}, {transform_indices = @transform_3, window_bounds = array<i64: 1, 32, 32>}, {transform_indices = @transform_4, window_bounds = array<i64: 1, 1, 32>}, {transform_indices = @transform_5, window_bounds = array<i64: 1, 32, 128>}, {transform_indices = @transform_6, window_bounds = array<i64: 1, 64, 32>}, {transform_indices = @transform_7, window_bounds = array<i64: 1, 1, 16, 64>}]} {
    %c0_i32 = arith.constant 0 : i32
    %0 = arith.cmpi eq, %arg1, %c0_i32 : i32
    %1 = arith.extui %0 : i1 to i32
    %c0_i32_0 = arith.constant 0 : i32
    %2 = arith.cmpi ne, %1, %c0_i32_0 : i32
    scf.if %2 {
      %c0_42 = arith.constant 0 : index
      %c0_43 = arith.constant 0 : index
      %c0_44 = arith.constant 0 : index
      %99 = vector.load %arg2[%c0_42, %c0_43, %c0_44] : memref<1x16x32xf32, #tpu.memory_space<vmem>>, vector<1x16x32xf32>
      %100 = vector.shape_cast %99 : vector<1x16x32xf32> to vector<16x32xf32>
      %c0_45 = arith.constant 0 : index
      %c0_46 = arith.constant 0 : index
      %101 = vector.load %arg10[%c0_45, %c0_46] : memref<16x32xf32, #tpu.memory_space<vmem>>, vector<16x32xf32>
      tpu.vector_store %arg10[%c0_45, %c0_46], %100 {strides = array<i32>} : memref<16x32xf32, #tpu.memory_space<vmem>>, vector<16x32xf32>,
    } else {
    }
    %c0 = arith.constant 0 : index
    %c0_1 = arith.constant 0 : index
    %3 = vector.load %arg10[%c0, %c0_1] : memref<16x32xf32, #tpu.memory_space<vmem>>, vector<16x32xf32>
    %c0_2 = arith.constant 0 : index
    %c0_3 = arith.constant 0 : index
    %c0_4 = arith.constant 0 : index
    %4 = vector.load %arg3[%c0_2, %c0_3, %c0_4] : memref<1x1x32xf32, #tpu.memory_space<vmem>>, vector<1x1x32xf32>
    %5 = vector.shape_cast %4 : vector<1x1x32xf32> to vector<1x32xf32>
    %c0_5 = arith.constant 0 : index
    %c0_6 = arith.constant 0 : index
    %c0_7 = arith.constant 0 : index
    %6 = vector.load %arg4[%c0_5, %c0_6, %c0_7] : memref<1x32x96xbf16, #tpu.memory_space<vmem>>, vector<1x32x96xbf16>
    %7 = vector.shape_cast %6 : vector<1x32x96xbf16> to vector<32x96xbf16>
    %c0_8 = arith.constant 0 : index
    %c0_9 = arith.constant 0 : index
    %c0_10 = arith.constant 0 : index
    %8 = vector.load %arg5[%c0_8, %c0_9, %c0_10] : memref<1x32x32xbf16, #tpu.memory_space<vmem>>, vector<1x32x32xbf16>
    %9 = vector.shape_cast %8 : vector<1x32x32xbf16> to vector<32x32xbf16>
    %c0_11 = arith.constant 0 : index
    %c0_12 = arith.constant 0 : index
    %c0_13 = arith.constant 0 : index
    %10 = vector.load %arg6[%c0_11, %c0_12, %c0_13] : memref<1x1x32xf32, #tpu.memory_space<vmem>>, vector<1x1x32xf32>
    %11 = vector.shape_cast %10 : vector<1x1x32xf32> to vector<1x32xf32>
    %c0_14 = arith.constant 0 : index
    %c0_15 = arith.constant 0 : index
    %c0_16 = arith.constant 0 : index
    %12 = vector.load %arg7[%c0_14, %c0_15, %c0_16] : memref<1x32x128xbf16, #tpu.memory_space<vmem>>, vector<1x32x128xbf16>
    %13 = vector.shape_cast %12 : vector<1x32x128xbf16> to vector<32x128xbf16>
    %c0_17 = arith.constant 0 : index
    %c0_18 = arith.constant 0 : index
    %c0_19 = arith.constant 0 : index
    %14 = vector.load %arg8[%c0_17, %c0_18, %c0_19] : memref<1x64x32xbf16, #tpu.memory_space<vmem>>, vector<1x64x32xbf16>
    %15 = vector.shape_cast %14 : vector<1x64x32xbf16> to vector<64x32xbf16>
    %16 = arith.mulf %3, %3 : vector<16x32xf32>
    %cst = arith.constant dense<0.000000e+00> : vector<16xf32>
    %17 = vector.multi_reduction <add>, %16, %cst [1] : vector<16x32xf32> to vector<16xf32>
    %18 = vector.shape_cast %17 : vector<16xf32> to vector<16x1xf32>
    %cst_20 = arith.constant 3.200000e+01 : f32
    %19 = vector.broadcast %cst_20 : f32 to vector<16x1xf32>
    %20 = arith.divf %18, %19 : vector<16x1xf32>
    %cst_21 = arith.constant 9.99999997E-7 : f32
    %21 = vector.broadcast %cst_21 : f32 to vector<16x1xf32>
    %22 = arith.addf %20, %21 : vector<16x1xf32>
    %23 = math.rsqrt %22 : vector<16x1xf32>
    %24 = vector.broadcast %23 : vector<16x1xf32> to vector<16x32xf32>
    %25 = arith.mulf %3, %24 : vector<16x32xf32>
    %26 = vector.broadcast %5 : vector<1x32xf32> to vector<16x32xf32>
    %27 = arith.mulf %25, %26 : vector<16x32xf32>
    %28 = arith.truncf %27 : vector<16x32xf32> to vector<16x32xbf16>
    %cst_22 = arith.constant dense<0.000000e+00> : vector<16x96xf32>
    %29 = tpu.matmul %28, %7, %cst_22 {dimension_numbers = #tpu.dot_dimension_numbers<[1], [0], [0], [1], [0, 0, 1, 1], [], []>} : vector<16x32xbf16>, vector<32x96xbf16>, vector<16x96xf32> -> vector<16x96xf32>
    %30 = vector.extract_strided_slice %29 {offsets = [0, 32], sizes = [16, 64], strides = [1, 1]} : vector<16x96xf32> to vector<16x64xf32>
    %31 = vector.extract_strided_slice %29 {offsets = [0, 0], sizes = [16, 32], strides = [1, 1]} : vector<16x96xf32> to vector<16x32xf32>
    %cst_23 = arith.constant 2.500000e-01 : f32
    %32 = vector.broadcast %cst_23 : f32 to vector<16x32xf32>
    %33 = arith.mulf %31, %32 : vector<16x32xf32>
    %34 = arith.truncf %33 : vector<16x32xf32> to vector<16x32xbf16>
    %35 = vector.shape_cast %34 : vector<16x32xbf16> to vector<16x2x16xbf16>
    %36 = vector.extract_strided_slice %29 {offsets = [0, 32], sizes = [16, 32], strides = [1, 1]} : vector<16x96xf32> to vector<16x32xf32>
    %37 = arith.truncf %36 : vector<16x32xf32> to vector<16x32xbf16>
    %38 = vector.shape_cast %37 : vector<16x32xbf16> to vector<16x2x16xbf16>
    %39 = vector.extract_strided_slice %29 {offsets = [0, 64], sizes = [16, 32], strides = [1, 1]} : vector<16x96xf32> to vector<16x32xf32>
    %40 = arith.truncf %39 : vector<16x32xf32> to vector<16x32xbf16>
    %41 = vector.shape_cast %40 : vector<16x32xbf16> to vector<16x2x16xbf16>
    "tpu.trace_start"() <{level = 10 : i32, message = "qhd,khd->hqk"}> : () -> ()
    %cst_24 = arith.constant dense<0.000000e+00> : vector<2x16x16xf32>
    %42 = tpu.matmul %35, %38, %cst_24 {dimension_numbers = #tpu.dot_dimension_numbers<[2], [2], [0], [0], [0, 1, 0, 0, 1, 0], [1], [1]>} : vector<16x2x16xbf16>, vector<16x2x16xbf16>, vector<2x16x16xf32> -> vector<2x16x16xf32>
    "tpu.trace_stop"() : () -> ()
    %43 = tpu.iota {dimensions = array<i32: 0>} : vector<16x16xi32>
    %44 = tpu.iota {dimensions = array<i32: 1>} : vector<16x16xi32>
    %45 = arith.cmpi sle, %44, %43 : vector<16x16xi32>
    %46 = vector.shape_cast %45 : vector<16x16xi1> to vector<1x16x16xi1>
    %cst_25 = arith.constant -1.000000e+30 : f32
    %47 = vector.shape_cast %46 : vector<1x16x16xi1> to vector<1x16x16xi1>
    %48 = vector.broadcast %47 : vector<1x16x16xi1> to vector<2x16x16xi1>
    %49 = vector.broadcast %cst_25 : f32 to vector<2x16x16xf32>
    %50 = arith.select %48, %42, %49 : vector<2x16x16xi1>, vector<2x16x16xf32>
    %cst_26 = arith.constant dense<0xFF800000> : vector<2x16xf32>
    %51 = vector.multi_reduction <maximumf>, %50, %cst_26 [2] : vector<2x16x16xf32> to vector<2x16xf32>
    %52 = vector.shape_cast %51 : vector<2x16xf32> to vector<2x16x1xf32>
    %53 = vector.broadcast %52 : vector<2x16x1xf32> to vector<2x16x16xf32>
    %54 = arith.subf %50, %53 : vector<2x16x16xf32>
    %55 = math.exp %54 : vector<2x16x16xf32>
    %cst_27 = arith.constant dense<0.000000e+00> : vector<2x16xf32>
    %56 = vector.multi_reduction <add>, %55, %cst_27 [2] : vector<2x16x16xf32> to vector<2x16xf32>
    %57 = vector.shape_cast %56 : vector<2x16xf32> to vector<2x16x1xf32>
    %58 = tpu.reciprocal %57 {approx = true} : vector<2x16x1xf32> -> vector<2x16x1xf32>
    %59 = vector.broadcast %58 : vector<2x16x1xf32> to vector<2x16x16xf32>
    %60 = arith.mulf %55, %59 : vector<2x16x16xf32>
    %61 = arith.truncf %60 : vector<2x16x16xf32> to vector<2x16x16xbf16>
    "tpu.trace_start"() <{level = 10 : i32, message = "hqk,khd->qhd"}> : () -> ()
    %cst_28 = arith.constant dense<0.000000e+00> : vector<2x16x16xf32>
    %62 = tpu.matmul %41, %61, %cst_28 {dimension_numbers = #tpu.dot_dimension_numbers<[0], [2], [2], [1], [0, 1, 0, 2, 1, 1], [1], [0]>} : vector<16x2x16xbf16>, vector<2x16x16xbf16>, vector<2x16x16xf32> -> vector<2x16x16xf32>
    %63 = tpu.transpose %62, [2, 0, 1] : vector<2x16x16xf32> -> vector<16x2x16xf32>
    "tpu.trace_stop"() : () -> ()
    %64 = vector.shape_cast %63 : vector<16x2x16xf32> to vector<16x32xf32>
    %65 = arith.truncf %64 : vector<16x32xf32> to vector<16x32xbf16>
    %cst_29 = arith.constant dense<0.000000e+00> : vector<16x32xf32>
    %66 = tpu.matmul %65, %9, %cst_29 {dimension_numbers = #tpu.dot_dimension_numbers<[1], [0], [0], [1], [0, 0, 1, 1], [], []>} : vector<16x32xbf16>, vector<32x32xbf16>, vector<16x32xf32> -> vector<16x32xf32>
    %67 = arith.addf %3, %66 : vector<16x32xf32>
    %68 = arith.mulf %67, %67 : vector<16x32xf32>
    %cst_30 = arith.constant dense<0.000000e+00> : vector<16xf32>
    %69 = vector.multi_reduction <add>, %68, %cst_30 [1] : vector<16x32xf32> to vector<16xf32>
    %70 = vector.shape_cast %69 : vector<16xf32> to vector<16x1xf32>
    %cst_31 = arith.constant 3.200000e+01 : f32
    %71 = vector.broadcast %cst_31 : f32 to vector<16x1xf32>
    %72 = arith.divf %70, %71 : vector<16x1xf32>
    %cst_32 = arith.constant 9.99999997E-7 : f32
    %73 = vector.broadcast %cst_32 : f32 to vector<16x1xf32>
    %74 = arith.addf %72, %73 : vector<16x1xf32>
    %75 = math.rsqrt %74 : vector<16x1xf32>
    %76 = vector.broadcast %75 : vector<16x1xf32> to vector<16x32xf32>
    %77 = arith.mulf %67, %76 : vector<16x32xf32>
    %78 = vector.broadcast %11 : vector<1x32xf32> to vector<16x32xf32>
    %79 = arith.mulf %77, %78 : vector<16x32xf32>
    %80 = arith.truncf %79 : vector<16x32xf32> to vector<16x32xbf16>
    %cst_33 = arith.constant dense<0.000000e+00> : vector<16x128xf32>
    %81 = tpu.matmul %80, %13, %cst_33 {dimension_numbers = #tpu.dot_dimension_numbers<[1], [0], [0], [1], [0, 0, 1, 1], [], []>} : vector<16x32xbf16>, vector<32x128xbf16>, vector<16x128xf32> -> vector<16x128xf32>
    %82 = vector.extract_strided_slice %81 {offsets = [0, 0], sizes = [16, 64], strides = [1, 1]} : vector<16x128xf32> to vector<16x64xf32>
    %83 = vector.extract_strided_slice %81 {offsets = [0, 64], sizes = [16, 64], strides = [1, 1]} : vector<16x128xf32> to vector<16x64xf32>
    %84 = arith.negf %82 : vector<16x64xf32>
    %85 = math.exp %84 : vector<16x64xf32>
    %cst_34 = arith.constant 1.000000e+00 : f32
    %86 = vector.broadcast %cst_34 : f32 to vector<16x64xf32>
    %87 = arith.addf %86, %85 : vector<16x64xf32>
    %88 = arith.divf %86, %87 : vector<16x64xf32>
    %89 = arith.mulf %82, %88 : vector<16x64xf32>
    %90 = arith.mulf %89, %83 : vector<16x64xf32>
    %91 = arith.truncf %90 : vector<16x64xf32> to vector<16x64xbf16>
    %cst_35 = arith.constant dense<0.000000e+00> : vector<16x32xf32>
    %92 = tpu.matmul %91, %15, %cst_35 {dimension_numbers = #tpu.dot_dimension_numbers<[1], [0], [0], [1], [0, 0, 1, 1], [], []>} : vector<16x64xbf16>, vector<64x32xbf16>, vector<16x32xf32> -> vector<16x32xf32>
    %93 = arith.addf %67, %92 : vector<16x32xf32>
    %94 = arith.truncf %30 : vector<16x64xf32> to vector<16x64xbf16>
    %c0_36 = arith.constant 0 : index
    %c0_37 = arith.constant 0 : index
    %c0_38 = arith.constant 0 : index
    %c0_39 = arith.constant 0 : index
    %95 = vector.load %arg9[%c0_36, %c0_37, %c0_38, %c0_39] : memref<1x1x16x64xbf16, #tpu.memory_space<vmem>>, vector<1x1x16x64xbf16>
    %96 = vector.shape_cast %95 : vector<1x1x16x64xbf16> to vector<16x64xbf16>
    %97 = vector.shape_cast %94 : vector<16x64xbf16> to vector<1x1x16x64xbf16>
    tpu.vector_store %arg9[%c0_36, %c0_37, %c0_38, %c0_39], %97 {strides = array<i32>} : memref<1x1x16x64xbf16, #tpu.memory_space<vmem>>, vector<1x1x16x64xbf16>,
    %c0_40 = arith.constant 0 : index
    %c0_41 = arith.constant 0 : index
    %98 = vector.load %arg10[%c0_40, %c0_41] : memref<16x32xf32, #tpu.memory_space<vmem>>, vector<16x32xf32>
    tpu.vector_store %arg10[%c0_40, %c0_41], %93 {strides = array<i32>} : memref<16x32xf32, #tpu.memory_space<vmem>>, vector<16x32xf32>,
    return
  }
  func.func @transform_0(%arg0: i32, %arg1: i32) -> (i32, i32, i32) {
    %c0_i32 = arith.constant 0 : i32
    %c0_i32_0 = arith.constant 0 : i32
    %c0_i32_1 = arith.constant 0 : i32
    return %arg0, %c0_i32, %c0_i32_0 : i32, i32, i32
  }
  func.func @transform_1(%arg0: i32, %arg1: i32) -> (i32, i32, i32) {
    %c0_i32 = arith.constant 0 : i32
    %c0_i32_0 = arith.constant 0 : i32
    %c0_i32_1 = arith.constant 0 : i32
    return %arg1, %c0_i32, %c0_i32_0 : i32, i32, i32
  }
  func.func @transform_2(%arg0: i32, %arg1: i32) -> (i32, i32, i32) {
    %c0_i32 = arith.constant 0 : i32
    %c0_i32_0 = arith.constant 0 : i32
    %c0_i32_1 = arith.constant 0 : i32
    return %arg1, %c0_i32, %c0_i32_0 : i32, i32, i32
  }
  func.func @transform_3(%arg0: i32, %arg1: i32) -> (i32, i32, i32) {
    %c0_i32 = arith.constant 0 : i32
    %c0_i32_0 = arith.constant 0 : i32
    %c0_i32_1 = arith.constant 0 : i32
    return %arg1, %c0_i32, %c0_i32_0 : i32, i32, i32
  }
  func.func @transform_4(%arg0: i32, %arg1: i32) -> (i32, i32, i32) {
    %c0_i32 = arith.constant 0 : i32
    %c0_i32_0 = arith.constant 0 : i32
    %c0_i32_1 = arith.constant 0 : i32
    return %arg1, %c0_i32, %c0_i32_0 : i32, i32, i32
  }
  func.func @transform_5(%arg0: i32, %arg1: i32) -> (i32, i32, i32) {
    %c0_i32 = arith.constant 0 : i32
    %c0_i32_0 = arith.constant 0 : i32
    %c0_i32_1 = arith.constant 0 : i32
    return %arg1, %c0_i32, %c0_i32_0 : i32, i32, i32
  }
  func.func @transform_6(%arg0: i32, %arg1: i32) -> (i32, i32, i32) {
    %c0_i32 = arith.constant 0 : i32
    %c0_i32_0 = arith.constant 0 : i32
    %c0_i32_1 = arith.constant 0 : i32
    return %arg1, %c0_i32, %c0_i32_0 : i32, i32, i32
  }
  func.func @transform_7(%arg0: i32, %arg1: i32) -> (i32, i32, i32, i32) {
    %c0_i32 = arith.constant 0 : i32
    %c0_i32_0 = arith.constant 0 : i32
    %c0_i32_1 = arith.constant 0 : i32
    return %arg1, %arg0, %c0_i32, %c0_i32_0 : i32, i32, i32, i32
  }
}

</mosaic_0001>

<bundles_post_ra>
// kernel: tpu_custom_call.1
= control target key start
LH: loop header
LB: loop body
LE: loop exit
PB: predicated region body
PF: predicated region fallthrough
CT: control target
= control target key end

     0   :  { %s2627_s0 = inlined_call_operand.vmem [shape: f32[4,16,32], index: 0, kind: input, shape index: {}]   ;;  %s2628_s1 = inlined_call_operand.vmem [shape: f32[2,1,32], index: 1, kind: input, shape index: {}]   ;;  %s2629_s2 = inlined_call_operand.vmem [shape: bf16[2,32,96], index: 2, kind: input, shape index: {}]   ;;  %s2630_s3 = inlined_call_operand.hbm [shape: bf16[2,32,32], index: 3, kind: input, shape index: {}]   ;;  %s2631_s4 = inlined_call_operand.vmem [shape: f32[2,1,32], index: 4, kind: input, shape index: {}]   ;;  %s2632_s5 = inlined_call_operand.hbm [shape: bf16[2,32,128], index: 5, kind: input, shape index: {}]   ;;  %s2633_s6 = inlined_call_operand.vmem [shape: bf16[2,64,32], index: 6, kind: input, shape index: {}]   ;;  %s2634_s7 = inlined_call_operand.hbm [shape: bf16[2,4,16,64], index: 7, kind: output, shape index: {}]  }
   0x1   :  { %2653 = sst [smem:[#allocation24_spill]] %s2630_s3 }
   0x2   :  { %2654 = sst [smem:[#allocation25_spill]] %s2632_s5 }
   0x3   :  { %2655 = sst [smem:[#allocation26_spill]] %s2634_s7 }
   0x4   :  { %12 = vsyncpa [#allocation4], 0 }
   0x5   :  { %14 = vsyncpa [#allocation4 + $0x1], 0 }
   0x6   :  { %15 = vsyncpa [#allocation7], 0 }
   0x7   :  { %17 = vsyncpa [#allocation7 + $0x1], 0 }
   0x8   :  { %18 = vsyncpa [#allocation5], 0 }
   0x9   :  { %20 = vsyncpa [#allocation5 + $0x1], 0  ;;  %s2175_s24 = smov 0   ;;  %s2177_s25 = smov 0  }
   0xa   :  { %s2179_s26 = smov 0   ;;  %s2181_s27 = smov 0  }
   0xb   :  { %s2183_s28 = smov 0   ;;  %s2185_s29 = smov 0  }
   0xc   :  { %s2187_s30 = smov 0   ;;  %s2189_s8 = smov 0  }
   0xd   :  { %s2191_s9 = smov 0   ;;  %s2193_s10 = smov 0  }
   0xe   :  { %s2195_s11 = smov 0  }
   0xf LB: > { %2656 = sst [smem:[#allocation12_spill]] %s2079_s24  ;;  %s1623_s12 = sadd.s32 4294967295, %s2119_s11   ;;  %s2119_s11 = sphi %s2195_s11, %s26_s11   ;;  %s2115_s10 = sphi %s2193_s10, %s2697_s10   ;;  %s2111_s9 = sphi %s2191_s9, %s2696_s9   ;;  %s2107_s8 = sphi %s2189_s8, %s2695_s8   ;;  %s2103_s30 = sphi %s2187_s30, %s2694_s30   ;;  %s2099_s29 = sphi %s2185_s29, %s2693_s29   ;;  %s2095_s28 = sphi %s2183_s28, %s2692_s28   ;;  %s2091_s27 = sphi %s2181_s27, %s2691_s27   ;;  %s2087_s26 = sphi %s2179_s26, %s2690_s26   ;;  %s2083_s25 = sphi %s2177_s25, %s2699_s25   ;;  %s2079_s24 = sphi %s2175_s24, %s2698_s24  }
  0x10   : > { %2657 = sst [smem:[#allocation13_spill]] %s2087_s26  ;;  %s1624_s13 = sadd.s32 4294967294, %s2119_s11  }
  0x11   : > { %2658 = sst [smem:[#allocation14_spill]] %s2095_s28  ;;  %s35_s14 = sadd.s32 1, %s2111_s9 }
  0x12   : > { %2659 = sst [smem:[#allocation15_spill]] %s2099_s29  ;;  %s38_s15 = sadd.s32 1, %s2115_s10 }
  0x13   : > { %2660 = sst [smem:[#allocation16_spill]] %s2111_s9  ;;  %p36_p0 = scmp.ge.s32.totalorder %s35_s14, 2 }
  0x14   : > { %2661 = sst [smem:[#allocation17_spill]] %s2115_s10  ;;  %s123_s16 = sadd.s32 1, %s2099_s29 }
  0x15   : > { %2662 = sst [smem:[#allocation18_spill]] %s2119_s11  ;;  %p130_p1 = scmp.ne.s32.totalorder %s2099_s29, %s2095_s28 }
  0x16   : > { %p131_p2 = scmp.eq.s32.totalorder %s2119_s11, 0  ;;  %s2701_s14 = smov (%p36_p0, %s35_s14), 0 }
  0x17   : > { %2663 = sst [smem:[#allocation19_spill]] %s2701_s14  ;;  %s2703_s15 = smov (!%p36_p0, %s38_s15), %s2115_s10 }
  0x18   : > { %s120_s17 = ssub.s32 %s2111_s9, %s2701_s14  ;;  %p2241_p3 = por %p131_p2, %p130_p1 }
  0x19   : > { %p40_p4 = scmp.ge.s32.totalorder %s2703_s15, 4  ;;  %p121_p5 = scmp.eq.s32.totalorder %s120_s17, 0 }
  0x1a   : > { %p136_p6 = scmp.ne.s32.totalorder %s2095_s28, %s2091_s27  ;;  %p137_p7 = scmp.eq.s32.totalorder %s1623_s12, 0 }
  0x1b   : > { %s2705_s15 = smov (%p40_p4, %s2703_s15), 0  ;;  %s229_s23 = sadd.s32 1, %s2087_s26 }
  0x1c   : > { %2665 = sst [smem:[#allocation20_spill]] %s2705_s15  ;;  %p2251_p8 = por %p137_p7, %p136_p6 }
  0x1d   : > { %s2249_s19 = scalar_select %p121_p5, %s2099_s29, %s123_s16  }
  0x1e   : > { %s2667_s20 = scalar_select %p2251_p8, 1, 0 }
  0x1f   : > { %2666 = sst [smem:[#allocation21_spill]] %s2249_s19  ;;  %s225_s21 = ssub.s32 %s2115_s10, %s2705_s15 }
  0x20   : > { %s226_s22 = sor.u32 %s225_s21, %s120_s17  ;;  %p239_p10 = scmp.ne.s32.totalorder %s2087_s26, %s2083_s25 }
  0x21   : > { %p227_p9 = scmp.eq.s32.totalorder %s226_s22, 0  ;;  %p240_p11 = scmp.eq.s32.totalorder %s1623_s12, 7 }
  0x22   : > { %p245_p12 = scmp.ne.s32.totalorder %s2083_s25, %s2079_s24  ;;  %p246_p0 = scmp.eq.s32.totalorder %s1624_s13, 7 }
  0x23   : > { %s2263_s27 = scalar_select %p227_p9, %s2087_s26, %s229_s23  }
  0x24   : > { %p2265_p13 = por %p240_p11, %p239_p10  ;;  %p1784_p1 = scmp.lt.s32.totalorder %s2119_s11, 8 }
  0x25   : > { %2668 = sst [smem:[#allocation22_spill]] %s2263_s27  ;;  %p2270_p2 = por %p246_p0, %p245_p12 }
  0x26   : > { %s2669_s16 = scalar_select %p2265_p13, 1, 0 }
  0x27   : > { %s2670_s14 = scalar_select %p2270_p2, 1, 0 }
  0x28   : > { %s2275_s17 = sand.u32 1, %s2099_s29   ;;  %s2639_s12 = sshll.u32 %s2111_s9, 8 }
  0x29   : > { %2671 = sst [smem:[#allocation23_spill]] %s2670_s14  ;;  %s2638_s21 = sshll.u32 %s2275_s17, 4 }
  0x2a   : > { %s2672_s3 = sld [smem:[#allocation24_spill]]  ;;  %s292_s13 = scalar_lea.vmem [#allocation3], %s2638_s21 }
  0x2b   : > { %s299_s10 = sshll.u32 %s292_s13, 4  ;;  %p2292_p4 = pnand %p1784_p1, %p2241_p3  ;;  %s2288_s10 = int_to_ptr.vmem [resolvable:$true] %s299_s10 }
  0x2d   : > { %p1935_p7 = pneg %p2292_p4 }
  0x30   : > { %s2284_s15 = scalar_lea.hbm %s2672_s3, %s2639_s12  ;;  %s1938_s18 = scalar_lea.hbm %s2672_s3, 512 }
  0x31   : > { %s1933_s23 = scalar_lea.hbm %s2284_s15, 256  ;;  %p1939_p3 = scmp.lt.u32.totalorder %s2284_s15, %s2672_s3 }
  0x32   : > { %p1934_p6 = scmp.ne.s32.totalorder %s2284_s15, %s1933_s23  ;;  %p1940_p11 = scmp.lt.u32.totalorder %s1938_s18, %s1933_s23 }
  0x33   : > { %p1942_p0 = scmp.lt.u32.totalorder %s1933_s23, %s2284_s15 }
  0x34   : > { %p1936_p9 = pnand %p1935_p7, %p1934_p6  ;;  %p1941_p12 = por %p1940_p11, %p1939_p3 }
  0x36   : > { %p1937_p10 = pneg %p1936_p9  ;;  %p1943_p1 = por %p1942_p0, %p1941_p12 }
  0x38   : > { %p1944_p5 = pnand %p1943_p1, %p1937_p10 }
  0x3a   : > { %1947 = shalt.err (!%p1944_p5)
}
  0x3b   : > { %s1948_s22 = scalar_lea.vmem %s2288_s10, 256  ;;  %s2121_s21 = smov [#allocation3]  }
  0x3c   : > { %p1949_p6 = scmp.ne.s32.totalorder %s2288_s10, %s1948_s22  ;;  %s1953_s13 = sshll.u32 %s2121_s21, 4  ;;  %s1954_s13 = int_to_ptr.vmem [resolvable:$false] %s1953_s13 }
  0x3d   : > { %s1955_s29 = scalar_lea.vmem %s1954_s13, 512  ;;  %p1956_p13 = scmp.lt.s32.totalorder %s2288_s10, %s1954_s13 }
  0x3e   : > { %p1951_p9 = pnand %p1949_p6, %p1935_p7  ;;  %p1957_p3 = scmp.lt.s32.totalorder %s1955_s29, %s1948_s22 }
  0x40   : > { %p1952_p2 = pneg %p1951_p9  ;;  %p1958_p11 = por %p1957_p3, %p1956_p13 }
  0x42   : > { %p1959_p12 = pnand %p1958_p11, %p1952_p2 }
  0x44   : > { %1962 = shalt.err (!%p1959_p12)
}
  0x45   : > { %s2644_s12 = smov 64   ;;  %s2123_s23 = smov 4  }
  0x46   : > { %s2674_s22 = scalar_lea.sflag [#allocation4], %s2275_s17  ;;  %p342_p13 = scmp.lt.s32.totalorder %s2119_s11, 9 }
  0x47   : > { %1776 = dma.hbm_to_vmem [thread:$0]  (!%p2292_p4), %s2284_s15, 256, %s2288_s10, %s2674_s22, %s2644_s12, %s2644_s12, %s2123_s23  }
  0x48   : > { %s2675_s18 = sshll.u32 %s2111_s9, 8  ;;  %s2676_s5 = sld [smem:[#allocation25_spill]] }
  0x49   : > { %p2677_p2 = scmp.ge.s32.totalorder %s2119_s11, 1  ;;  %s2679_s27 = sshll.u32 %s2275_s17, 4 }
  0x4a   : > { %s319_s26 = scalar_lea.vmem [#allocation6], %s2679_s27  ;;  %s316_s10 = scalar_lea.sflag [#allocation7], %s2275_s17 }
  0x4b   : > { %p2338_p5 = pnand %p2677_p2, %p342_p13  ;;  %s326_s14 = sshll.u32 %s319_s26, 4  ;;  %s2344_s14 = int_to_ptr.vmem [resolvable:$true] %s326_s14 }
  0x4e   : > { %s2334_s29 = scalar_lea.hbm %s2676_s5, %s2675_s18  ;;  %s1968_s21 = scalar_lea.hbm %s2676_s5, 512 }
  0x4f   : > { %s1963_s15 = scalar_lea.hbm %s2334_s29, 256  ;;  %p1969_p6 = scmp.lt.u32.totalorder %s2334_s29, %s2676_s5 }
  0x50   : > { %p1964_p10 = scmp.ne.s32.totalorder %s2334_s29, %s1963_s15  ;;  %p1970_p9 = scmp.lt.u32.totalorder %s1968_s21, %s1963_s15 }
  0x51   : > { %p1972_p11 = scmp.lt.u32.totalorder %s1963_s15, %s2334_s29 }
  0x52   : > { %p1966_p0 = pnand %p1964_p10, %p1935_p7  ;;  %p1971_p3 = por %p1970_p9, %p1969_p6 }
  0x54   : > { %p1967_p1 = pneg %p1966_p0  ;;  %p1973_p12 = por %p1972_p11, %p1971_p3 }
  0x56   : > { %p1974_p13 = pnand %p1973_p12, %p1967_p1 }
  0x58   : > { %1977 = shalt.err (!%p1974_p13)
}
  0x59   : > { %s1978_s26 = scalar_lea.vmem %s2344_s14, 256  ;;  %s2124_s27 = smov [#allocation6]  }
  0x5a   : > { %p1979_p2 = scmp.ne.s32.totalorder %s2344_s14, %s1978_s26  ;;  %s1983_s22 = sshll.u32 %s2124_s27, 4  ;;  %s1984_s22 = int_to_ptr.vmem [resolvable:$false] %s1983_s22 }
  0x5b   : > { %s1985_s12 = scalar_lea.vmem %s1984_s22, 512  ;;  %p1986_p8 = scmp.lt.s32.totalorder %s2344_s14, %s1984_s22 }
  0x5c   : > { %p1981_p10 = pnand %p1979_p2, %p1935_p7  ;;  %p1987_p6 = scmp.lt.s32.totalorder %s1985_s12, %s1978_s26 }
  0x5e   : > { %p1982_p0 = pneg %p1981_p10  ;;  %p1988_p9 = por %p1987_p6, %p1986_p8 }
  0x60   : > { %p1989_p3 = pnand %p1988_p9, %p1982_p0 }
  0x62   : > { %1992 = shalt.err (!%p1989_p3)
}
  0x63   : > { %s2680_s15 = smov 64   ;;  %346 = sbr.rel (%p2338_p5) target bundleno = 2807 (0xaf7), region = 48 }
  0x64   : > { %1779 = dma.hbm_to_vmem [thread:$0]  (!%p2292_p4), %s2334_s29, 256, %s2344_s14, %s316_s10, %s2680_s15, %s2680_s15, %s2123_s23  }
  0x65   : > { %s348_s18 = sand.u32 (!%p2338_p5), 1, %s2095_s28   ;;  %p2681_p8 = scmp.ne.s32.totalorder (!%p2338_p5), %s2667_s20, 0 }
  0x66   : > { %s1634_s21 = sshll.u32 (!%p2338_p5), %s348_s18, 4  ;;  %s349_s13 = scalar_lea.sflag (!%p2338_p5), [#allocation4], %s348_s18 }
  0x67   : > { %s2378_s26 = scalar_lea.vmem (!%p2338_p5), [#allocation3], %s1634_s21 }
  0x6a   : > { %2066 = dma.done.wait (%p2681_p8), %s349_s13, 256  }
  0x6b   : > { %2068 = vsyncadd (%p2681_p8), %s349_s13, 4294967040  ;;  %s358_s19 = scalar_lea.sflag [#allocation7], %s348_s18  ;;  %s2384_s17 = scalar_lea.vmem [#allocation6], %s1634_s21 }
  0x6c   : > { %2070 = dma.done.wait (%p2681_p8), %s358_s19, 256  }
  0x6d   : > { %2072 = vsyncadd (%p2681_p8), %s358_s19, 4294967040  ;;  %s2646_s3 = sand.u32 1, %s2083_s25   ;;  %p418_p4 = scmp.lt.s32.totalorder %s2107_s8, 3 }
  0x6e   : > { %s1636_s14 = sshll.u32 %s2646_s3, 3  ;;  %p423_p7 = scmp.lt.s32.totalorder %s2103_s30, 1 }
  0x6f   : > { %s419_s23 = scalar_select %p418_p4, %s2107_s8, 3 }
  0x70   : > { %s2397_s29 = scalar_select %p423_p7, %s2103_s30, 1 }
  0x71   : > { %s1680_s20 = sshll.u32 %s419_s23, 4  ;;  %p1643_p5 = scmp.ne.s32.totalorder %s2103_s30, 0 }
  0x72   : > { %s422_s22 = scalar_lea.vmem %s2627_s0, %s1680_s20  ;;  %s425_s18 = scalar_lea.vmem %s2628_s1, %s2397_s29  ;;  %vm446_vm0 = vcmask (!%p1643_p5), 261120  }
  0x73   : > { %s1681_s21 = sshll.u32 %s2397_s29, 4  ;;  %s433_s3 = scalar_lea.vmem %s2631_s4, %s2397_s29  ;;  %v444_v0 = vld [vmem:[%s422_s22] sm:$0xff] (!%p1643_p5)  ;;  %v445_v1 = vld [vmem:[%s422_s22 + $0x8] sm:$0xff] (!%p1643_p5) }
  0x74   : > { %s430_s28 = scalar_lea.vmem %s2629_s2, %s1681_s21  ;;  %s1682_s24 = sshll.u32 %s2397_s29, 5  ;;  %447 = vst.msk [vmem:[#allocation2] sm:$0xff] (!%p1643_p5), %vm446_vm0, %v444_v0  ;;  %448 = vst.msk [vmem:[#allocation2 + $0x8] sm:$0xff] (!%p1643_p5), %vm446_vm0, %v445_v1 }
  0x75   : > { %s2418_s7 = scalar_lea.vmem %s2633_s6, %s1682_s24  ;;  %s2420_s20 = scalar_lea.vmem [#allocation8], %s1636_s14 }
  0x76   : > { %443 = sbr.rel (%p1643_p5) target bundleno = 125 (0x7d), region = 60 }
  0x7d PF: > { %v2423_v2 = vld [vmem:[#allocation2] sm:$0xff]  ;;  %vm475_vm1 = vcmask 261120   ;;  %v2425_v3 = vld [vmem:[#allocation2 + $0x8] sm:$0xff]  ;;  %v2125_v9 = vmov 0.0   ;;  %vm2126_vm2 = vmmov 0   ;;  %s2128_s9 = smov 96   ;;  %v693_v39 = vlaneseq }
  0x7e   : > { %v473_v4 = vmul.f32 %v2423_v2, %v2423_v2  ;;  %v474_v5 = vmul.f32 %v2425_v3, %v2425_v3  ;;  %v1891_v8 = vld [vmem:[%s430_s28] sm:$0xff]   ;;  %1707 = vmatprep.subr.bf16.mxu0 %v2125_v9  ;;  %1711 = vmatprep.mubr.msk.bf16.mxu0 %vm2126_vm2, %v2125_v9  ;;  %v1892_v10 = vld [vmem:[%s430_s28 + $0x8] sm:$0xff]   ;;  %s2127_s28 = smov 112   ;;  %vm604_vm3 = vcmask 130048   ;;  %s2129_s11 = smov 64   ;;  %vm1438_vm6 = vcmask 519168  }
  0x7f   : > { %1708 = vmatpush3.bf16.msra.mxu0 %v1891_v8  ;;  %1715 = vmatprep.subr.bf16.mxu1 %v2125_v9  ;;  %v1644_v20 = vld [vmem:[%s425_s18] ss:$0 sm:$0xff]  ;;  %v2469_v40 = vshrl.u32 %v693_v39, 7  ;;  %v697_v41 = vand.u32 127, %v693_v39  ;;  %vm1381_vm7 = vcmask 523264   ;;  %s1459_s27 = sshll.u32 %s2420_s20, 4  ;;  %s2556_s27 = int_to_ptr.vmem [resolvable:$true] %s1459_s27 }
  0x80   : > { %v476_v6 = vsel %vm475_vm1, %v473_v4, 0.0  ;;  %v479_v7 = vsel %vm475_vm1, %v474_v5, 0.0  ;;  %1709 = vmatprep.subr.bf16.mxu0 %v2125_v9  ;;  %1717 = vmatprep.mubr.msk.bf16.mxu1 %vm2126_vm2, %v2125_v9  ;;  %s2682_s15 = sld [smem:[#allocation26_spill]]  ;;  %s2683_s21 = sand.u32 1, %s2083_s25  }
  0x81   : > { %477 = vadd.xlane.f32.xlu0 %v476_v6  ;;  %v695_v42 = vadd.s32 8, %v2469_v40  ;;  %vm698_vm4 = vcmp.le.s32.totalorder %v697_v41, %v2469_v40  ;;  %s2560_s13 = scalar_lea.sflag [#allocation5], %s2683_s21  ;;  %s1993_s19 = scalar_lea.vmem %s2556_s27, 128 }
  0x82   : > { %p1994_p1 = scmp.ne.s32.totalorder %s2556_s27, %s1993_s19  ;;  %p2684_p11 = scmp.ne.s32.totalorder %s2669_s16, 0 }
  0x83   : > { %1710 = vmatpush3.bf16.msra.mxu0 %v1892_v10  ;;  %vm699_vm5 = vcmp.le.s32.totalorder %v697_v41, %v695_v42 }
  0x84   : > { %1739 = vmatprep.subr.bf16.mxu0 %v2125_v9  ;;  %p1995_p12 = pnand %p1994_p1, %p2684_p11 }
  0x85   : > { %480 = vadd.xlane.f32.xlu0 %v479_v7 }
  0x86   : > { %p1996_p13 = pneg %p1995_p12 }
 0x10e   : > { %v478_v11 = vpop.xlane.xlu0 %477 }
 0x10f   : > { %v483_v12 = vmul.f32 0.03125, %v478_v11 }
 0x111   : > { %v485_v13 = vadd.f32 1e-06, %v483_v12 }
 0x112   : > { %v481_v14 = vpop.xlane.xlu0 %480 }
 0x113   : > { %1901 = vrsqrt.f32 %v485_v13  ;;  %v484_v15 = vmul.f32 0.03125, %v481_v14 }
 0x115   : > { %v486_v16 = vadd.f32 1e-06, %v484_v15 }
 0x117   : > { %1903 = vrsqrt.f32 %v486_v16 }
 0x11d   : > { %v1902_v17 = vpop.eup %1901 }
 0x11e   : > { %v489_v18 = vmul.f32 %v1902_v17, %v2423_v2 }
 0x120   : > { %v497_v22 = vmul.f32 %v1644_v20, %v489_v18 }
 0x121   : > { %v1904_v19 = vpop.eup %1903 }
 0x122   : > { %v490_v21 = vmul.f32 %v1904_v19, %v2425_v3 }
 0x124   : > { %v498_v23 = vmul.f32 %v1644_v20, %v490_v21 }
 0x126   : > { %v499_v24 = vpack.c.bf16 %v498_v23, %v497_v22 }
 0x128   : > { %1712 = vmatmul.mubr.msk.bf16.vlgmr.msra.gmra.mrb[0].mxu0 %vm475_vm1, %v499_v24 }
 0x129   : > { %1743 = vmatprep.mubr.msk.bf16.mxu0 %vm2126_vm2, %v2125_v9 }
 0x1fb   : > { %v2451_v25 = vpop.f32.mrb[0].mxu0 }
 0x1fc   : > { %v1713_v26 = vpop.f32.mrb[1].mxu0  ;;  %v556_v28 = vmul.f32 0.25, %v2451_v25 }
 0x1fd   : > { %v2453_v27 = vpop.f32.mrb[2].mxu0 }
 0x1fe   : > { %v557_v29 = vmul.f32 0.25, %v2453_v27  ;;  %v562_v30 = vpack.c.bf16 %v2453_v27, %v2451_v25  ;;  %v1714_v31 = vpop.f32.mrb[3].mxu0 }
 0x200   : > { %564 = vrot.lane.b32.xlu1 %v562_v30, %s2127_s28  ;;  %v558_v32 = vpack.c.bf16 %v557_v29, %v556_v28 }
 0x204   : > { %566 = vrot.lane.b32.xlu1 %v562_v30, %s2128_s9 }
 0x208   : > { %560 = vrot.lane.b32.xlu1 %v558_v32, %s2127_s28 }
 0x272   : > { %v565_v33 = vpop.permute.xlu1 %564 }
 0x273   : > { %568 = vrot.lane.b32.xlu0 %v565_v33, %s2128_s9 }
 0x276   : > { %v567_v34 = vpop.permute.xlu1 %566 }
 0x277   : > { %572 = vxpose.xlu1.c.b16.start.end [1/1] (short) (narrow) %v567_v34, 16 }
 0x27a   : > { %v561_v35 = vpop.permute.xlu1 %560 }
 0x2dd   : > { %v580_v36 = vpop.trf.xlu1 }
 0x2de   : > { %1716 = vmatpush3.bf16.msra.mxu1 %v580_v36 }
 0x2df   : > { %1721 = vmatprep.subr.bf16.mxu1 %v2125_v9 }
 0x2e1   : > { %1718 = vmatmul.mubr.msk.bf16.vlgmr.msra.gmra.mrb[0].mxu1 %vm604_vm3, %v558_v32 }
 0x2e2   : > { %1723 = vmatprep.mubr.msk.bf16.mxu1 %vm2126_vm2, %v2125_v9 }
 0x2e5   : > { %v569_v37 = vpop.permute.xlu0 %568 }
 0x2e6   : > { %588 = vxpose.xlu0.c.b16.start.end [1/1] (short) (narrow) %v569_v37, 16 }
 0x34c   : > { %v596_v38 = vpop.trf.xlu0 }
 0x34d   : > { %1722 = vmatpush3.bf16.msra.mxu1 %v596_v38 }
 0x34e   : > { %1727 = vmatprep.subr.bf16.mxu1 %v2125_v9 }
 0x350   : > { %1724 = vmatmul.mubr.msk.bf16.vlgmr.msra.gmra.mrb[4].mxu1 %vm604_vm3, %v561_v35 }
 0x351   : > { %1729 = vmatprep.mubr.msk.bf16.mxu1 %vm2126_vm2, %v2125_v9 }
 0x3b4   : > { %v642_v43 = vpop.f32.mrb[0].mxu1 }
 0x3b5   : > { %v704_v44 = vsel %vm698_vm4, %v642_v43, -1e+30  ;;  %v1719_v45 = vpop.f32.mrb[1].mxu1 }
 0x3b6   : > { %v645_v46 = vpop.f32.mrb[2].mxu1  ;;  %v708_v47 = vsel %vm604_vm3, %v704_v44, -inf }
 0x3b7   : > { %v705_v48 = vsel %vm699_vm5, %v645_v46, -1e+30  ;;  %709 = vmax.xlane.f32.xlu1 %v708_v47  ;;  %v1720_v49 = vpop.f32.mrb[3].mxu1 }
 0x3b8   : > { %v711_v50 = vsel %vm604_vm3, %v705_v48, -inf  ;;  %v1893_v49 = vld [vmem:[%s2378_s26] sm:$0xff]  }
 0x3b9   : > { %712 = vmax.xlane.f32.xlu0 %v711_v50  ;;  %1740 = vmatpush3.bf16.msra.mxu0 %v1893_v49  ;;  %v2130_v50 = vmov 1983009808  }
 0x3ba   : > { %1741 = vmatprep.subr.bf16.mxu0 %v2125_v9 }
 0x423   : > { %v686_v51 = vpop.f32.mrb[4].mxu1 }
 0x424   : > { %v706_v52 = vsel %vm698_vm4, %v686_v51, -1e+30  ;;  %v1725_v53 = vpop.f32.mrb[5].mxu1  ;;  %v952_v51 = vunpack.c.l.s4 %v2130_v50 }
 0x425   : > { %v689_v54 = vpop.f32.mrb[6].mxu1  ;;  %v714_v55 = vsel %vm604_vm3, %v706_v52, -inf  ;;  %v2131_v53 = vmov 1934713408  }
 0x426   : > { %v707_v56 = vsel %vm699_vm5, %v689_v54, -1e+30  ;;  %715 = vmax.xlane.f32.xlu1 %v714_v55  ;;  %v1726_v57 = vpop.f32.mrb[7].mxu1  ;;  %v983_v54 = vunpack.c.l.s4 %v2131_v53 }
 0x427   : > { %v717_v58 = vsel %vm604_vm3, %v707_v56, -inf }
 0x428   : > { %v984_v57 = vunpack.c.0.s8 %v983_v54 }
 0x42a   : > { %718 = vmax.xlane.f32.xlu1 %v717_v58 }
 0x43b   : > { %754 = vrot.lane.b32.xlu1 %v562_v30, %s2129_s11 }
 0x444   : > { %v710_v59 = vpop.xlane.xlu1 %709 }
 0x445   : > { %v720_v60 = vsub.f32 %v704_v44, %v710_v59 }
 0x446   : > { %v713_v61 = vpop.xlane.xlu0 %712 }
 0x447   : > { %v724_v62 = vmul.f32 1.442695, %v720_v60  ;;  %v721_v63 = vsub.f32 %v705_v48, %v713_v61 }
 0x449   : > { %1905 = vpow2.f32 %v724_v62  ;;  %v726_v0 = vmul.f32 1.442695, %v721_v63  ;;  %v987_v62 = vsub.s32 %v984_v57, %v2469_v40 }
 0x44b   : > { %1907 = vpow2.f32 %v726_v0 }
 0x453   : > { %v1906_v1 = vpop.eup %1905 }
 0x454   : > { %v732_v4 = vsel %vm604_vm3, %v1906_v1, 0.0 }
 0x455   : > { %v1908_v5 = vpop.eup %1907  ;;  %733 = vadd.xlane.f32.xlu0 %v732_v4 }
 0x456   : > { %v735_v6 = vsel %vm604_vm3, %v1908_v5, 0.0 }
 0x459   : > { %736 = vadd.xlane.f32.xlu0 %v735_v6 }
 0x46f   : > { %756 = vrot.lane.b32.xlu0 %v565_v33, %s2129_s11 }
 0x4b3   : > { %v716_v7 = vpop.xlane.xlu1 %715 }
 0x4b4   : > { %v722_v8 = vsub.f32 %v706_v52, %v716_v7  ;;  %v953_v52 = vunpack.c.0.s8 %v952_v51 }
 0x4b6   : > { %v728_v10 = vmul.f32 1.442695, %v722_v8 }
 0x4b7   : > { %v719_v11 = vpop.xlane.xlu1 %718 }
 0x4b8   : > { %1909 = vpow2.f32 %v728_v10  ;;  %v723_v12 = vsub.f32 %v707_v56, %v719_v11  ;;  %v956_v56 = vsub.s32 %v953_v52, %v2469_v40 }
 0x4ba   : > { %v730_v13 = vmul.f32 1.442695, %v723_v12 }
 0x4bb   : > { %v755_v21 = vpop.permute.xlu1 %754 }
 0x4bc   : > { %1911 = vpow2.f32 %v730_v13 }
 0x4c2   : > { %v1910_v14 = vpop.eup %1909 }
 0x4c3   : > { %v738_v15 = vsel %vm604_vm3, %v1910_v14, 0.0 }
 0x4c4   : > { %739 = vadd.xlane.f32.xlu1 %v738_v15 }
 0x4c6   : > { %v1912_v16 = vpop.eup %1911 }
 0x4c7   : > { %v741_v17 = vsel %vm604_vm3, %v1912_v16, 0.0 }
 0x4c8   : > { %742 = vadd.xlane.f32.xlu0 %v741_v17 }
 0x4e2   : > { %v734_v18 = vpop.xlane.xlu0 %733 }
 0x4e3   : > { %1913 = vrcp.f32 %v734_v18 }
 0x4e6   : > { %v737_v19 = vpop.xlane.xlu0 %736 }
 0x4e7   : > { %1915 = vrcp.f32 %v737_v19 }
 0x4ea   : > { %v757_v26 = vpop.permute.xlu0 %756 }
 0x4ed   : > { %v1914_v20 = vpop.eup %1913 }
 0x4ee   : > { %v748_v23 = vmul.f32 %v1914_v20, %v1906_v1 }
 0x4f1   : > { %v1916_v22 = vpop.eup %1915  ;;  %760 = vxpose.xlu1.c.b16.start.end [1/1] (short) (narrow) %v755_v21, 16 }
 0x4f2   : > { %v749_v24 = vmul.f32 %v1916_v22, %v1908_v5 }
 0x4f4   : > { %v752_v28 = vpack.c.bf16 %v749_v24, %v748_v23 }
 0x4f5   : > { %776 = vxpose.xlu0.c.b16.start.end [1/1] (short) (narrow) %v757_v26, 16 }
 0x4f6   : > { %v796_v29 = vsel %vm604_vm3, %v752_v28, 0 }
 0x4f7   : > { %1728 = vmatpush3.bf16.xpose.msra.mxu1 %v796_v29 }
 0x4f8   : > { %1733 = vmatprep.subr.bf16.mxu1 %v2125_v9 }
 0x551   : > { %v740_v30 = vpop.xlane.xlu1 %739 }
 0x552   : > { %1917 = vrcp.f32 %v740_v30 }
 0x555   : > { %v743_v31 = vpop.xlane.xlu0 %742 }
 0x556   : > { %1919 = vrcp.f32 %v743_v31 }
 0x557   : > { %v768_v32 = vpop.trf.xlu1 }
 0x558   : > { %1730 = vmatmul.mubr.msk.bf16.vlgmr.msra.gmra.mrb[8].mxu1 %vm604_vm3, %v768_v32 }
 0x559   : > { %1735 = vmatprep.mubr.msk.bf16.mxu1 %vm2126_vm2, %v2125_v9 }
 0x55b   : > { %v784_v39 = vpop.trf.xlu0 }
 0x55c   : > { %v1918_v33 = vpop.eup %1917 }
 0x55d   : > { %v750_v35 = vmul.f32 %v1918_v33, %v1910_v14 }
 0x560   : > { %v1920_v34 = vpop.eup %1919 }
 0x561   : > { %v751_v36 = vmul.f32 %v1920_v34, %v1912_v16 }
 0x563   : > { %v753_v37 = vpack.c.bf16 %v751_v36, %v750_v35 }
 0x565   : > { %v843_v38 = vsel %vm604_vm3, %v753_v37, 0 }
 0x566   : > { %1734 = vmatpush3.bf16.xpose.msra.mxu1 %v843_v38 }
 0x567   : > { %1747 = vmatprep.subr.bf16.mxu1 %v2125_v9 }
 0x56d   : > { %1736 = vmatmul.mubr.msk.bf16.vlgmr.msra.gmra.mrb[12].mxu1 %vm604_vm3, %v784_v39 }
 0x56e   : > { %1751 = vmatprep.mubr.msk.bf16.mxu1 %vm2126_vm2, %v2125_v9 }
 0x62b   : > { %v832_v41 = vpop.f32.mrb[8].mxu1 }
 0x62c   : > { %886 = vxpose.xlu1.b32.start [1/2] (short) (narrow) %v832_v41, 16  ;;  %v1731_v42 = vpop.f32.mrb[9].mxu1 }
 0x62d   : > { %v835_v43 = vpop.f32.mrb[10].mxu1 }
 0x62e   : > { %v1732_v44 = vpop.f32.mrb[11].mxu1 }
 0x630   : > { %887 = vxpose.xlu1.b32.end [2/2] (short) (narrow) %v835_v43, 16  ;;  %v1894_v43 = vld [vmem:[%s2378_s26 + $0x8] sm:$0xff]   ;;  %s2132_s26 = smov 16  }
 0x631   : > { %1742 = vmatpush3.bf16.msra.mxu0 %v1894_v43 }
 0x632   : > { %1755 = vmatprep.subr.bf16.mxu0 %v2125_v9 }
 0x640   : > { %v879_v45 = vpop.f32.mrb[12].mxu1 }
 0x641   : > { %918 = vxpose.xlu0.b32.start [1/2] (short) (narrow) %v879_v45, 16  ;;  %v1737_v46 = vpop.f32.mrb[13].mxu1 }
 0x642   : > { %v882_v47 = vpop.f32.mrb[14].mxu1 }
 0x643   : > { %v1738_v48 = vpop.f32.mrb[15].mxu1 }
 0x645   : > { %919 = vxpose.xlu0.b32.end [2/2] (short) (narrow) %v882_v47, 16 }
 0x6ac   : > { %v902_v55 = vpop.trf.xlu1 }
 0x6ad   : > { %v950_v58 = vcombine.high %v902_v55, %v2125_v9  ;;  %v957_v59 = vrot.slane %v902_v55, %v956_v56 }
 0x6af   : > { %v964_v63 = vrot.slane %v950_v58, %v956_v56 }
 0x6b0   : > { %v903_v60 = vpop.trf.xlu1 }
 0x6b1   : > { %v1016_v4 = vcombine.high %v903_v60, %v2125_v9  ;;  %v1023_v8 = vrot.slane %v903_v60, %v956_v56 }
 0x6b3   : > { %v1030_v15 = vrot.slane %v1016_v4, %v956_v56 }
 0x6c1   : > { %v934_v61 = vpop.trf.xlu0 }
 0x6c2   : > { %v965_v0 = vcombine.high %v934_v61, %v2125_v9  ;;  %v972_v1 = vrot.slane %v934_v61, %v956_v56 }
 0x6c4   : > { %v979_v5 = vrot.slane %v965_v0, %v956_v56  ;;  %v980_v6 = vcombine.low %v957_v59, %v972_v1  ;;  %v981_v7 = vcombine.high %v957_v59, %v972_v1 }
 0x6c5   : > { %v935_v10 = vpop.trf.xlu0 }
 0x6c6   : > { %v988_v11 = vrot.slane %v980_v6, %v987_v62  ;;  %v995_v12 = vrot.slane %v981_v7, %v987_v62  ;;  %v996_v13 = vcombine.low %v964_v63, %v979_v5  ;;  %v997_v14 = vcombine.high %v964_v63, %v979_v5 }
 0x6c7   : > { %v1031_v16 = vcombine.high %v935_v10, %v2125_v9  ;;  %v1038_v17 = vrot.slane %v935_v10, %v956_v56 }
 0x6c8   : > { %v1004_v40 = vrot.slane %v996_v13, %v987_v62  ;;  %v1011_v18 = vrot.slane %v997_v14, %v987_v62  ;;  %v1082_v19 = vcombine.low %v988_v11, %v995_v12  ;;  %v1652_v20 = vcombine.high %v988_v11, %v995_v12 }
 0x6c9   : > { %v1045_v21 = vrot.slane %v1031_v16, %v956_v56  ;;  %v1046_v22 = vcombine.low %v1023_v8, %v1038_v17  ;;  %v1047_v23 = vcombine.high %v1023_v8, %v1038_v17 }
 0x6ca   : > { %v1089_v24 = vrot.slane %v1082_v19, %v956_v56  ;;  %v1097_v26 = vrot.slane %v1652_v20, %v956_v56  ;;  %v1098_v28 = vcombine.low %v1004_v40, %v1011_v18  ;;  %v1653_v29 = vcombine.high %v1004_v40, %v1011_v18 }
 0x6cb   : > { %v1054_v30 = vrot.slane %v1046_v22, %v987_v62  ;;  %v1061_v31 = vrot.slane %v1047_v23, %v987_v62  ;;  %v1062_v32 = vcombine.low %v1030_v15, %v1045_v21  ;;  %v1063_v33 = vcombine.high %v1030_v15, %v1045_v21 }
 0x6cc   : > { %v1105_v34 = vrot.slane %v1098_v28, %v956_v56  ;;  %v1113_v35 = vrot.slane %v1653_v29, %v956_v56  ;;  %v1114_v36 = vcombine.low %v1089_v24, %v1097_v26  ;;  %v1659_v24 = vld [vmem:[%s433_s3] ss:$0 sm:$0xff] }
 0x6cd   : > { %v1070_v37 = vrot.slane %v1062_v32, %v987_v62  ;;  %v1077_v38 = vrot.slane %v1063_v33, %v987_v62  ;;  %v1132_v39 = vcombine.low %v1054_v30, %v1061_v31  ;;  %v1654_v41 = vcombine.high %v1054_v30, %v1061_v31  ;;  %v1897_v31 = vld [vmem:[%s2418_s7] sm:$0xff]   ;;  %v1898_v32 = vld [vmem:[%s2418_s7 + $0x8] sm:$0xff]   ;;  %v1899_v33 = vld [vmem:[%s2418_s7 + $0x10] sm:$0xff]  }
 0x6ce   : > { %v1122_v42 = vcombine.low %v1105_v34, %v1113_v35  ;;  %v1121_v48 = vrot.slane %v1114_v36, %v987_v62  ;;  %v1900_v34 = vld [vmem:[%s2418_s7 + $0x18] sm:$0xff]   ;;  %s1673_s7 = sshll.u32 %s2107_s8, 1 }
 0x6cf   : > { %v1139_v44 = vrot.slane %v1132_v39, %v956_v56  ;;  %v1147_v45 = vrot.slane %v1654_v41, %v956_v56  ;;  %v1148_v46 = vcombine.low %v1070_v37, %v1077_v38  ;;  %v1655_v47 = vcombine.high %v1070_v37, %v1077_v38 }
 0x6d0   : > { %v1129_v49 = vrot.slane %v1122_v42, %v987_v62  ;;  %v1683_v38 = vpack.c.bf16 %v2451_v25, %v2451_v25  ;;  %v1684_v41 = vpack.c.bf16 %v2453_v27, %v2453_v27 }
 0x6d1   : > { %v1155_v50 = vrot.slane %v1148_v46, %v956_v56  ;;  %v1163_v51 = vrot.slane %v1655_v47, %v956_v56  ;;  %v1164_v52 = vcombine.low %v1139_v44, %v1147_v45 }
 0x6d2   : > { %v1130_v53 = vcombine.low %v1121_v48, %v1129_v49  ;;  %v1131_v58 = vcombine.high %v1121_v48, %v1129_v49 }
 0x6d3   : > { %v1172_v54 = vcombine.low %v1155_v50, %v1163_v51  ;;  %v1171_v55 = vrot.slane %v1164_v52, %v987_v62 }
 0x6d5   : > { %v1179_v57 = vrot.slane %v1172_v54, %v987_v62 }
 0x6d7   : > { %v1181_v59 = vcombine.high %v1171_v55, %v1179_v57  ;;  %v1180_v60 = vcombine.low %v1171_v55, %v1179_v57 }
 0x6d9   : > { %v1886_v61 = vpack.i.bf16 %v1181_v59, %v1131_v58 }
 0x6db   : > { %1887 = vrot.lane.b32.xlu1 %v1886_v61, %s2132_s26 }
 0x74d   : > { %v1888_v63 = vpop.permute.xlu1 %1887 }
 0x74e   : > { %v1890_v0 = vunpack.i.h.bf16 %v1888_v63  ;;  %v1889_v1 = vunpack.i.l.bf16 %v1888_v63 }
 0x750   : > { %v1190_v4 = vsel %vm604_vm3, %v1130_v53, %v1889_v1  ;;  %v1191_v56 = vsel %vm604_vm3, %v1180_v60, %v1890_v0 }
 0x751   : > { %v1192_v5 = vpack.c.bf16 %v1191_v56, %v1190_v4 }
 0x753   : > { %1744 = vmatmul.mubr.msk.bf16.vlgmr.msra.gmra.mrb[4].mxu0 %vm475_vm1, %v1192_v5 }
 0x754   : > { %1763 = vmatprep.mubr.msk.bf16.mxu0 %vm2126_vm2, %v2125_v9  ;;  %1756 = vmatpush3.bf16.msra.mxu0 %v1897_v31 }
 0x755   : > { %1757 = vmatprep.subr.bf16.mxu0 %v2125_v9 }
 0x758   : > { %1758 = vmatpush3.bf16.msra.mxu0 %v1898_v32 }
 0x759   : > { %1759 = vmatprep.subr.bf16.mxu0 %v2125_v9 }
 0x75c   : > { %1760 = vmatpush3.bf16.msra.mxu0 %v1899_v33 }
 0x75d   : > { %1761 = vmatprep.subr.bf16.mxu0 %v2125_v9 }
 0x760   : > { %1762 = vmatpush3.bf16.msra.mxu0 %v1900_v34 }
 0x826   : > { %v1242_v62 = vpop.f32.mrb[4].mxu0 }
 0x827   : > { %v2509_v6 = vadd.f32 %v1242_v62, %v2423_v2  ;;  %v1745_v7 = vpop.f32.mrb[5].mxu0  ;;  %v1895_v2 = vld [vmem:[%s2384_s17] sm:$0xff]  }
 0x828   : > { %v1245_v8 = vpop.f32.mrb[6].mxu0  ;;  %1748 = vmatpush3.bf16.msra.mxu1 %v1895_v2 }
 0x829   : > { %v2512_v10 = vadd.f32 %v1245_v8, %v2425_v3  ;;  %v1746_v11 = vpop.f32.mrb[7].mxu0  ;;  %v1251_v12 = vmul.f32 %v2509_v6, %v2509_v6  ;;  %1749 = vmatprep.subr.bf16.mxu1 %v2125_v9  ;;  %v1896_v3 = vld [vmem:[%s2384_s17 + $0x8] sm:$0xff]   ;;  %s1674_s17 = sshll.u32 %s2103_s30, 3  ;;  %s2133_s30 = smov [#allocation8]  }
 0x82a   : > { %s1456_s3 = sadd.s32 %s1674_s17, %s1673_s7  ;;  %s1997_s8 = sshll.u32 %s2133_s30, 4  ;;  %s1998_s8 = int_to_ptr.vmem [resolvable:$false] %s1997_s8 }
 0x82b   : > { %v1253_v13 = vsel %vm475_vm1, %v1251_v12, 0.0  ;;  %v1252_v14 = vmul.f32 %v2512_v10, %v2512_v10  ;;  %s1675_s29 = sshll.u32 %s1456_s3, 6  ;;  %s1999_s23 = scalar_lea.vmem %s1998_s8, 256 }
 0x82c   : > { %1254 = vadd.xlane.f32.xlu0 %v1253_v13  ;;  %1750 = vmatpush3.bf16.msra.mxu1 %v1896_v3  ;;  %s2554_s18 = scalar_lea.hbm %s2682_s15, %s1675_s29  ;;  %p2000_p2 = scmp.lt.s32.totalorder %s2556_s27, %s1998_s8 }
 0x82d   : > { %v1256_v15 = vsel %vm475_vm1, %v1252_v14, 0.0  ;;  %p2001_p10 = scmp.lt.s32.totalorder %s1999_s23, %s1993_s19 }
 0x82e   : > { %1257 = vadd.xlane.f32.xlu1 %v1256_v15 }
 0x82f   : > { %p2002_p0 = por %p2001_p10, %p2000_p2 }
 0x831   : > { %p2003_p6 = pnand %p2002_p0, %p1996_p13 }
 0x8b9   : > { %v1255_v16 = vpop.xlane.xlu0 %1254 }
 0x8ba   : > { %v1259_v17 = vmul.f32 0.03125, %v1255_v16 }
 0x8bb   : > { %v1258_v40 = vpop.xlane.xlu1 %1257 }
 0x8bc   : > { %v1261_v18 = vadd.f32 1e-06, %v1259_v17  ;;  %v1260_v19 = vmul.f32 0.03125, %v1258_v40 }
 0x8be   : > { %1921 = vrsqrt.f32 %v1261_v18  ;;  %v1262_v20 = vadd.f32 1e-06, %v1260_v19 }
 0x8c0   : > { %1923 = vrsqrt.f32 %v1262_v20 }
 0x8c8   : > { %v1922_v21 = vpop.eup %1921 }
 0x8c9   : > { %v1265_v22 = vmul.f32 %v1922_v21, %v2509_v6 }
 0x8ca   : > { %v1924_v23 = vpop.eup %1923 }
 0x8cb   : > { %v1266_v26 = vmul.f32 %v1924_v23, %v2512_v10  ;;  %v1273_v28 = vmul.f32 %v1659_v24, %v1265_v22 }
 0x8cd   : > { %v1274_v29 = vmul.f32 %v1659_v24, %v1266_v26 }
 0x8cf   : > { %v1275_v30 = vpack.c.bf16 %v1274_v29, %v1273_v28 }
 0x8d1   : > { %1752 = vmatmul.mubr.msk.bf16.vlgmr.msra.gmra.mrb[16].mxu1 %vm475_vm1, %v1275_v30 }
 0x9a4   : > { %v1325_v35 = vpop.f32.mrb[16].mxu1 }
 0x9a5   : > { %1348 = vrot.lane.b32.xlu0 %v1325_v35, %s2129_s11  ;;  %v1753_v36 = vpop.f32.mrb[17].mxu1  ;;  %v1663_v9 = vmul.f32 -1.442695, %v1325_v35 }
 0x9a6   : > { %v1328_v37 = vpop.f32.mrb[18].mxu1 }
 0x9a7   : > { %1350 = vrot.lane.b32.xlu1 %v1328_v37, %s2129_s11  ;;  %v1754_v39 = vpop.f32.mrb[19].mxu1  ;;  %v1664_v42 = vmul.f32 -1.442695, %v1328_v37  ;;  %1925 = vpow2.f32 %v1663_v9 }
 0x9a9   : > { %1432 = vrot.lane.b32.xlu0 %v1683_v38, %s2128_s9  ;;  %1927 = vpow2.f32 %v1664_v42 }
 0x9ad   : > { %1434 = vrot.lane.b32.xlu0 %v1684_v41, %s2128_s9 }
 0x9b1   : > { %v1926_v43 = vpop.eup %1925 }
 0x9b2   : > { %v1338_v45 = vadd.f32 1.0, %v1926_v43 }
 0x9b3   : > { %v1928_v44 = vpop.eup %1927 }
 0x9b4   : > { %v1339_v46 = vadd.f32 1.0, %v1928_v44  ;;  %1929 = vrcp.f32 %v1338_v45 }
 0x9b6   : > { %1931 = vrcp.f32 %v1339_v46 }
 0x9be   : > { %v1930_v25 = vpop.eup %1929 }
 0x9bf   : > { %v1344_v27 = vmul.f32 %v1930_v25, %v1325_v35 }
 0x9c0   : > { %v1932_v47 = vpop.eup %1931 }
 0x9c1   : > { %v1345_v49 = vmul.f32 %v1932_v47, %v1328_v37 }
 0xa17   : > { %v1349_v48 = vpop.permute.xlu0 %1348 }
 0xa18   : > { %v1354_v51 = vmul.f32 %v1349_v48, %v1344_v27 }
 0xa19   : > { %v1351_v50 = vpop.permute.xlu1 %1350 }
 0xa1a   : > { %v1355_v52 = vmul.f32 %v1351_v50, %v1345_v49 }
 0xa1b   : > { %v1433_v53 = vpop.permute.xlu0 %1432 }
 0xa1c   : > { %v1356_v54 = vpack.c.bf16 %v1355_v52, %v1354_v51  ;;  %1439 = vst.msk [vmem:[%s2420_s20] sm:$0xf] %vm1438_vm6, %v1433_v53 }
 0xa1e   : > { %1764 = vmatmul.mubr.msk.bf16.vlgmr.msra.gmra.mrb[8].mxu0 %vm1381_vm7, %v1356_v54 }
 0xa1f   : > { %v1435_v55 = vpop.permute.xlu0 %1434 }
 0xa20   : > { %1440 = vst.msk [vmem:[%s2420_s20 + $0x4] sm:$0xf] %vm1438_vm6, %v1435_v55 }
 0xa21   : > { %2006 = shalt.err (!%p2003_p6)
}
 0xa22   : > { %s2007_s20 = scalar_lea.hbm %s2554_s18, 128  ;;  %s2011_s28 = scalar_lea.hbm %s2682_s15, 1024 }
 0xa23   : > { %p2008_p9 = scmp.ne.s32.totalorder %s2554_s18, %s2007_s20  ;;  %p2012_p4 = scmp.lt.u32.totalorder %s2554_s18, %s2682_s15 }
 0xa24   : > { %p2013_p7 = scmp.lt.u32.totalorder %s2011_s28, %s2007_s20  ;;  %p2015_p1 = scmp.lt.u32.totalorder %s2007_s20, %s2554_s18 }
 0xa25   : > { %p2009_p3 = pnand %p2008_p9, %p2684_p11 }
 0xa26   : > { %p2014_p5 = por %p2013_p7, %p2012_p4 }
 0xa27   : > { %p2010_p8 = pneg %p2009_p3 }
 0xa28   : > { %p2016_p12 = por %p2015_p1, %p2014_p5 }
 0xa2a   : > { %p2017_p13 = pnand %p2016_p12, %p2010_p8 }
 0xa2c   : > { %2020 = shalt.err (!%p2017_p13)
}
 0xa2d   : > { %s2134_s14 = smov 4  }
 0xa2e   : > { %1771 = dma.vmem_to_hbm [thread:$0]  (%p2684_p11), %s2556_s27, 128, %s2554_s18, %s2560_s13, %s2129_s11, %s2129_s11, %s2134_s14  }
 0xaf1   : > { %v1419_v57 = vpop.f32.mrb[8].mxu0 }
 0xaf2   : > { %v1426_v58 = vadd.f32 %v1419_v57, %v2509_v6  ;;  %v1765_v59 = vpop.f32.mrb[9].mxu0 }
 0xaf3   : > { %v1422_v60 = vpop.f32.mrb[10].mxu0 }
 0xaf4   : > { %1441 = vst.msk [vmem:[#allocation2] sm:$0xff] %vm475_vm1, %v1426_v58  ;;  %v1427_v61 = vadd.f32 %v1422_v60, %v2512_v10  ;;  %v1766_v63 = vpop.f32.mrb[11].mxu0 }
 0xaf6   : > { %1442 = vst.msk [vmem:[#allocation2 + $0x8] sm:$0xff] %vm475_vm1, %v1427_v61 }
 0xaf7 PF: > { %s2685_s16 = sld [smem:[#allocation18_spill]]  ;;  %s2686_s10 = sld [smem:[#allocation12_spill]] }
 0xaf8   : > { %s2687_s7 = sld [smem:[#allocation23_spill]] }
 0xafd   : > { %p1785_p2 = scmp.ge.s32.totalorder %s2685_s16, 2  ;;  %s1474_s17 = sand.u32 1, %s2686_s10  }
 0xafe   : > { %p2688_p10 = scmp.ne.s32.totalorder %s2687_s7, 0  ;;  %s1475_s11 = scalar_lea.sflag [#allocation5], %s1474_s17 }
 0xb00   : > { %p1781_p11 = pnand %p1785_p2, %p2688_p10 }
 0xb02   : > { %2074 = dma.done.wait (!%p1781_p11), %s1475_s11, 128  }
 0xb03   : > { %2076 = vsyncadd (!%p1781_p11), %s1475_s11, 4294967168  ;;  %s26_s11 = sadd.s32 1, %s2685_s16   ;;  %s2689_s3 = sld [smem:[#allocation13_spill]] }
 0xb04   : > { %p23_p0 = scmp.ge.s32.totalorder %s26_s11, 10   ;;  %s2690_s26 = sld [smem:[#allocation22_spill]] }
 0xb05   : > { %s2691_s27 = sld [smem:[#allocation14_spill]]  ;;  %s2692_s28 = sld [smem:[#allocation15_spill]] }
 0xb06   : > { %s2693_s29 = sld [smem:[#allocation21_spill]]  ;;  %s2694_s30 = sld [smem:[#allocation16_spill]] }
 0xb07   : > { %s2695_s8 = sld [smem:[#allocation17_spill]]  ;;  %s2696_s9 = sld [smem:[#allocation19_spill]] }
 0xb08   : > { %s2697_s10 = sld [smem:[#allocation20_spill]]  ;;  %s2698_s24 = smov %s2083_s25 }
 0xb09   : > { %s2699_s25 = smov %s2689_s3  ;;  %25 = sbr.rel (!%p23_p0) target bundleno = 15 (0xf), region = 125 }
 0xb10   :  { %1480 = vsyncpa [#allocation4], 1 }
 0xb11   :  { %1482 = vsyncpa [#allocation4 + $0x1], 1 }
 0xb12   :  { %1483 = vsyncpa [#allocation7], 1 }
 0xb13   :  { %1485 = vsyncpa [#allocation7 + $0x1], 1 }
 0xb14   :  { %1486 = vsyncpa [#allocation5], 1 }
 0xb15   :  { %1488 = vsyncpa [#allocation5 + $0x1], 1 }

</bundles_post_ra>
